<compile_context>
chip_gen: v5e
topology: v5e:2x2
jax: 0.10.0
libtpu: 0.0.40
codegen_flags: <defaults>
</compile_context>

<pallas_src>
import jax
import jax.numpy as jnp
from jax.experimental import pallas as pl
from jax.experimental.pallas import tpu as pltpu


def _round_up(a, b):
    return ((a + b - 1) // b) * b


def _make_encoder_kernel(n_layers, col_offsets, col_dims, d_slab):
    """Kernel closure over static column offsets of the packed output slab."""

    def kernel(*refs):
        x_ref = refs[0]                              # (tile_n, d_in) bf16
        param_refs = refs[1:1 + 2 * n_layers]        # w1,b1,...,w6,b6 (resident)
        out_ref = refs[1 + 2 * n_layers]             # (tile_n, d_slab) f32

        h = x_ref[...]                               # bf16
        for i in range(n_layers):
            w = param_refs[2 * i][...]               # bf16 (d_in_i, d_out_i)
            b = param_refs[2 * i + 1][...]           # f32  (1, d_out_i)
            acc = jnp.dot(h, w, preferred_element_type=jnp.float32) + b
            if i < n_layers - 1:                     # last layer: no activation
                acc = jnp.maximum(acc, 0.0)
            off, d = col_offsets[i], col_dims[i]
            out_ref[:, off:off + d] = acc            # pack into dense slab
            h = acc.astype(jnp.bfloat16)             # feed next layer in bf16

        used = col_offsets[-1] + col_dims[-1]
        if used < d_slab:                            # zero the padding lanes
            out_ref[:, used:] = jnp.zeros(
                (out_ref.shape[0], d_slab - used), jnp.float32)

    return kernel


def encoder_forward(x, params, tile_n=2048):
    """x: (N, in_channels) f32. params: list of (W, b) with W (in, out), b (1, out).

    Returns (x1, x2, x3, x4, x5, x_enc) as f32 arrays, matching the PyTorch
    forward (matmuls run in bf16 on the MXU with f32 accumulation).
    """
    N, d_in = x.shape
    n_layers = len(params)
    dims_out = [w.shape[1] for (w, _) in params]

    # Packed output slab layout (lane-dense writeback).
    col_offsets = []
    off = 0
    for d in dims_out:
        col_offsets.append(off)
        off += d
    d_slab = _round_up(off, 128)

    # Batch tiling: multiple of 8 (sublane), pad N up to a tile multiple.
    tile_n = max(8, min(tile_n, _round_up(N, 8)))
    n_pad = _round_up(N, tile_n)
    if n_pad != N:
        x = jnp.pad(x, ((0, n_pad - N), (0, 0)))
    x_bf16 = x.astype(jnp.bfloat16)

    in_specs = [pl.BlockSpec((tile_n, d_in), lambda i: (i, 0))]
    flat_params = []
    for (w, b) in params:
        # Full-shape blocks with constant index -> weights stay resident in VMEM.
        in_specs.append(pl.BlockSpec(w.shape, lambda i: (0, 0)))
        in_specs.append(pl.BlockSpec(b.shape, lambda i: (0, 0)))
        flat_params.extend([w.astype(jnp.bfloat16), b])

    out_spec = pl.BlockSpec((tile_n, d_slab), lambda i: (i, 0))
    out_shape = jax.ShapeDtypeStruct((n_pad, d_slab), jnp.float32)

    kernel = _make_encoder_kernel(n_layers, col_offsets, dims_out, d_slab)

    slab = pl.pallas_call(
        kernel,
        grid=(n_pad // tile_n,),
        in_specs=in_specs,
        out_specs=out_spec,
        out_shape=out_shape,
        compiler_params=pltpu.CompilerParams(
            dimension_semantics=("parallel",),
            vmem_limit_bytes=32 << 20,
        ),
    )(x_bf16, *flat_params)

    # Unpack the slab back into the six per-layer outputs.
    return tuple(
        slab[:N, o:o + d] for o, d in zip(col_offsets, dims_out))


def init_params(key, in_channels, out_channels):
    """Deterministic init mimicking nn.Linear shapes (W stored transposed)."""
    dims = [in_channels,
            in_channels // 2,
            in_channels // 4,
            in_channels // 8,
            in_channels // 16,
            in_channels // 32,
            out_channels]
    params = []
    for i in range(6):
        d_in, d_out = dims[i], dims[i + 1]
        key, kw, kb = jax.random.split(key, 3)
        bound = 1.0 / (d_in ** 0.5)
        w = jax.random.uniform(kw, (d_in, d_out), jnp.float32, -bound, bound)
        b = jax.random.uniform(kb, (1, d_out), jnp.float32, -bound, bound)
        params.append((w, b))
    return params


def encoder_reference(x, params):
    """Reference mirroring the kernel's bf16-input / f32-accumulate matmuls."""
    outs = []
    h = x
    for i, (w, b) in enumerate(params):
        hq = h.astype(jnp.bfloat16).astype(jnp.float32)
        wq = w.astype(jnp.bfloat16).astype(jnp.float32)
        h = hq @ wq + b
        if i < len(params) - 1:
            h = jnp.maximum(h, 0.0)
        outs.append(h)
    return tuple(outs)


if __name__ == "__main__":
    in_channels = 128     # must be divisible by 32 for the layer widths
    out_channels = 3
    batch = 16            # demo size; production batches get 2048-row tiles

    key = jax.random.PRNGKey(0)
    key, kx = jax.random.split(key)
    x = jax.random.normal(kx, (batch, in_channels), jnp.float32)

    params = init_params(jax.random.PRNGKey(0), in_channels, out_channels)

    outs = encoder_forward(x, params)
    outs = jax.block_until_ready(outs)

    refs = encoder_reference(x, params)
    for o, r in zip(outs, refs):
        assert o.shape == r.shape and o.dtype == r.dtype
        assert float(jnp.max(jnp.abs(o - r))) < 2e-2

    print("KERNEL_OK")
</pallas_src>

<mosaic_0001>
module attributes {stable_mosaic.version = 11 : i64} {
  func.func @kernel(%arg0: i32, %arg1: memref<16x128xbf16, #tpu.memory_space<vmem>>, %arg2: memref<128x64xbf16, #tpu.memory_space<vmem>>, %arg3: memref<1x64xf32, #tpu.memory_space<vmem>>, %arg4: memref<64x32xbf16, #tpu.memory_space<vmem>>, %arg5: memref<1x32xf32, #tpu.memory_space<vmem>>, %arg6: memref<32x16xbf16, #tpu.memory_space<vmem>>, %arg7: memref<1x16xf32, #tpu.memory_space<vmem>>, %arg8: memref<16x8xbf16, #tpu.memory_space<vmem>>, %arg9: memref<1x8xf32, #tpu.memory_space<vmem>>, %arg10: memref<8x4xbf16, #tpu.memory_space<vmem>>, %arg11: memref<1x4xf32, #tpu.memory_space<vmem>>, %arg12: memref<4x3xbf16, #tpu.memory_space<vmem>>, %arg13: memref<1x3xf32, #tpu.memory_space<vmem>>, %arg14: memref<16x128xf32, #tpu.memory_space<vmem>>) attributes {dimension_semantics = [#tpu.dimension_semantics<parallel>], iteration_bounds = array<i64: 1>, scalar_prefetch = 0 : i64, scratch_operands = 0 : i64, tpu.core_type = #tpu.core_type<tc>, window_params = [{transform_indices = @transform_0, window_bounds = array<i64: 16, 128>}, {pipeline_mode = #tpu.pipeline_mode<synchronous>, transform_indices = @transform_1, window_bounds = array<i64: 128, 64>}, {pipeline_mode = #tpu.pipeline_mode<synchronous>, transform_indices = @transform_2, window_bounds = array<i64: 1, 64>}, {pipeline_mode = #tpu.pipeline_mode<synchronous>, transform_indices = @transform_3, window_bounds = array<i64: 64, 32>}, {pipeline_mode = #tpu.pipeline_mode<synchronous>, transform_indices = @transform_4, window_bounds = array<i64: 1, 32>}, {pipeline_mode = #tpu.pipeline_mode<synchronous>, transform_indices = @transform_5, window_bounds = array<i64: 32, 16>}, {pipeline_mode = #tpu.pipeline_mode<synchronous>, transform_indices = @transform_6, window_bounds = array<i64: 1, 16>}, {pipeline_mode = #tpu.pipeline_mode<synchronous>, transform_indices = @transform_7, window_bounds = array<i64: 16, 8>}, {pipeline_mode = #tpu.pipeline_mode<synchronous>, transform_indices = @transform_8, window_bounds = array<i64: 1, 8>}, {pipeline_mode = #tpu.pipeline_mode<synchronous>, transform_indices = @transform_9, window_bounds = array<i64: 8, 4>}, {pipeline_mode = #tpu.pipeline_mode<synchronous>, transform_indices = @transform_10, window_bounds = array<i64: 1, 4>}, {pipeline_mode = #tpu.pipeline_mode<synchronous>, transform_indices = @transform_11, window_bounds = array<i64: 4, 3>}, {pipeline_mode = #tpu.pipeline_mode<synchronous>, transform_indices = @transform_12, window_bounds = array<i64: 1, 3>}, {transform_indices = @transform_13, window_bounds = array<i64: 16, 128>}]} {
    %c0 = arith.constant 0 : index
    %c0_0 = arith.constant 0 : index
    %0 = vector.load %arg1[%c0, %c0_0] : memref<16x128xbf16, #tpu.memory_space<vmem>>, vector<16x128xbf16>
    %c0_1 = arith.constant 0 : index
    %c0_2 = arith.constant 0 : index
    %1 = vector.load %arg2[%c0_1, %c0_2] : memref<128x64xbf16, #tpu.memory_space<vmem>>, vector<128x64xbf16>
    %c0_3 = arith.constant 0 : index
    %c0_4 = arith.constant 0 : index
    %2 = vector.load %arg3[%c0_3, %c0_4] : memref<1x64xf32, #tpu.memory_space<vmem>>, vector<1x64xf32>
    %cst = arith.constant dense<0.000000e+00> : vector<16x64xf32>
    %3 = tpu.matmul %0, %1, %cst {dimension_numbers = #tpu.dot_dimension_numbers<[1], [0], [0], [1], [0, 0, 1, 1], [], []>} : vector<16x128xbf16>, vector<128x64xbf16>, vector<16x64xf32> -> vector<16x64xf32>
    %4 = vector.broadcast %2 : vector<1x64xf32> to vector<16x64xf32>
    %5 = arith.addf %3, %4 : vector<16x64xf32>
    %cst_5 = arith.constant 0.000000e+00 : f32
    %6 = vector.broadcast %cst_5 : f32 to vector<16x64xf32>
    %7 = arith.maximumf %5, %6 : vector<16x64xf32>
    %c0_6 = arith.constant 0 : index
    %c0_7 = arith.constant 0 : index
    %8 = vector.load %arg14[%c0_6, %c0_7] : memref<16x128xf32, #tpu.memory_space<vmem>>, vector<16x64xf32>
    tpu.vector_store %arg14[%c0_6, %c0_7], %7 {strides = array<i32>} : memref<16x128xf32, #tpu.memory_space<vmem>>, vector<16x64xf32>,
    %9 = arith.truncf %7 : vector<16x64xf32> to vector<16x64xbf16>
    %c0_8 = arith.constant 0 : index
    %c0_9 = arith.constant 0 : index
    %10 = vector.load %arg4[%c0_8, %c0_9] : memref<64x32xbf16, #tpu.memory_space<vmem>>, vector<64x32xbf16>
    %c0_10 = arith.constant 0 : index
    %c0_11 = arith.constant 0 : index
    %11 = vector.load %arg5[%c0_10, %c0_11] : memref<1x32xf32, #tpu.memory_space<vmem>>, vector<1x32xf32>
    %cst_12 = arith.constant dense<0.000000e+00> : vector<16x32xf32>
    %12 = tpu.matmul %9, %10, %cst_12 {dimension_numbers = #tpu.dot_dimension_numbers<[1], [0], [0], [1], [0, 0, 1, 1], [], []>} : vector<16x64xbf16>, vector<64x32xbf16>, vector<16x32xf32> -> vector<16x32xf32>
    %13 = vector.broadcast %11 : vector<1x32xf32> to vector<16x32xf32>
    %14 = arith.addf %12, %13 : vector<16x32xf32>
    %cst_13 = arith.constant 0.000000e+00 : f32
    %15 = vector.broadcast %cst_13 : f32 to vector<16x32xf32>
    %16 = arith.maximumf %14, %15 : vector<16x32xf32>
    %c0_14 = arith.constant 0 : index
    %c64 = arith.constant 64 : index
    %17 = vector.load %arg14[%c0_14, %c64] : memref<16x128xf32, #tpu.memory_space<vmem>>, vector<16x32xf32>
    tpu.vector_store %arg14[%c0_14, %c64], %16 {strides = array<i32>} : memref<16x128xf32, #tpu.memory_space<vmem>>, vector<16x32xf32>,
    %18 = arith.truncf %16 : vector<16x32xf32> to vector<16x32xbf16>
    %c0_15 = arith.constant 0 : index
    %c0_16 = arith.constant 0 : index
    %19 = vector.load %arg6[%c0_15, %c0_16] : memref<32x16xbf16, #tpu.memory_space<vmem>>, vector<32x16xbf16>
    %c0_17 = arith.constant 0 : index
    %c0_18 = arith.constant 0 : index
    %20 = vector.load %arg7[%c0_17, %c0_18] : memref<1x16xf32, #tpu.memory_space<vmem>>, vector<1x16xf32>
    %cst_19 = arith.constant dense<0.000000e+00> : vector<16x16xf32>
    %21 = tpu.matmul %18, %19, %cst_19 {dimension_numbers = #tpu.dot_dimension_numbers<[1], [0], [0], [1], [0, 0, 1, 1], [], []>} : vector<16x32xbf16>, vector<32x16xbf16>, vector<16x16xf32> -> vector<16x16xf32>
    %22 = vector.broadcast %20 : vector<1x16xf32> to vector<16x16xf32>
    %23 = arith.addf %21, %22 : vector<16x16xf32>
    %cst_20 = arith.constant 0.000000e+00 : f32
    %24 = vector.broadcast %cst_20 : f32 to vector<16x16xf32>
    %25 = arith.maximumf %23, %24 : vector<16x16xf32>
    %c0_21 = arith.constant 0 : index
    %c96 = arith.constant 96 : index
    %26 = vector.load %arg14[%c0_21, %c96] : memref<16x128xf32, #tpu.memory_space<vmem>>, vector<16x16xf32>
    tpu.vector_store %arg14[%c0_21, %c96], %25 {strides = array<i32>} : memref<16x128xf32, #tpu.memory_space<vmem>>, vector<16x16xf32>,
    %27 = arith.truncf %25 : vector<16x16xf32> to vector<16x16xbf16>
    %c0_22 = arith.constant 0 : index
    %c0_23 = arith.constant 0 : index
    %28 = vector.load %arg8[%c0_22, %c0_23] : memref<16x8xbf16, #tpu.memory_space<vmem>>, vector<16x8xbf16>
    %c0_24 = arith.constant 0 : index
    %c0_25 = arith.constant 0 : index
    %29 = vector.load %arg9[%c0_24, %c0_25] : memref<1x8xf32, #tpu.memory_space<vmem>>, vector<1x8xf32>
    %cst_26 = arith.constant dense<0.000000e+00> : vector<16x8xf32>
    %30 = tpu.matmul %27, %28, %cst_26 {dimension_numbers = #tpu.dot_dimension_numbers<[1], [0], [0], [1], [0, 0, 1, 1], [], []>} : vector<16x16xbf16>, vector<16x8xbf16>, vector<16x8xf32> -> vector<16x8xf32>
    %31 = vector.broadcast %29 : vector<1x8xf32> to vector<16x8xf32>
    %32 = arith.addf %30, %31 : vector<16x8xf32>
    %cst_27 = arith.constant 0.000000e+00 : f32
    %33 = vector.broadcast %cst_27 : f32 to vector<16x8xf32>
    %34 = arith.maximumf %32, %33 : vector<16x8xf32>
    %c0_28 = arith.constant 0 : index
    %c112 = arith.constant 112 : index
    %35 = vector.load %arg14[%c0_28, %c112] : memref<16x128xf32, #tpu.memory_space<vmem>>, vector<16x8xf32>
    tpu.vector_store %arg14[%c0_28, %c112], %34 {strides = array<i32>} : memref<16x128xf32, #tpu.memory_space<vmem>>, vector<16x8xf32>,
    %36 = arith.truncf %34 : vector<16x8xf32> to vector<16x8xbf16>
    %c0_29 = arith.constant 0 : index
    %c0_30 = arith.constant 0 : index
    %37 = vector.load %arg10[%c0_29, %c0_30] : memref<8x4xbf16, #tpu.memory_space<vmem>>, vector<8x4xbf16>
    %c0_31 = arith.constant 0 : index
    %c0_32 = arith.constant 0 : index
    %38 = vector.load %arg11[%c0_31, %c0_32] : memref<1x4xf32, #tpu.memory_space<vmem>>, vector<1x4xf32>
    %cst_33 = arith.constant dense<0.000000e+00> : vector<16x4xf32>
    %39 = tpu.matmul %36, %37, %cst_33 {dimension_numbers = #tpu.dot_dimension_numbers<[1], [0], [0], [1], [0, 0, 1, 1], [], []>} : vector<16x8xbf16>, vector<8x4xbf16>, vector<16x4xf32> -> vector<16x4xf32>
    %40 = vector.broadcast %38 : vector<1x4xf32> to vector<16x4xf32>
    %41 = arith.addf %39, %40 : vector<16x4xf32>
    %cst_34 = arith.constant 0.000000e+00 : f32
    %42 = vector.broadcast %cst_34 : f32 to vector<16x4xf32>
    %43 = arith.maximumf %41, %42 : vector<16x4xf32>
    %c0_35 = arith.constant 0 : index
    %c120 = arith.constant 120 : index
    %44 = vector.load %arg14[%c0_35, %c120] : memref<16x128xf32, #tpu.memory_space<vmem>>, vector<16x4xf32>
    tpu.vector_store %arg14[%c0_35, %c120], %43 {strides = array<i32>} : memref<16x128xf32, #tpu.memory_space<vmem>>, vector<16x4xf32>,
    %45 = arith.truncf %43 : vector<16x4xf32> to vector<16x4xbf16>
    %c0_36 = arith.constant 0 : index
    %c0_37 = arith.constant 0 : index
    %46 = vector.load %arg12[%c0_36, %c0_37] : memref<4x3xbf16, #tpu.memory_space<vmem>>, vector<4x3xbf16>
    %c0_38 = arith.constant 0 : index
    %c0_39 = arith.constant 0 : index
    %47 = vector.load %arg13[%c0_38, %c0_39] : memref<1x3xf32, #tpu.memory_space<vmem>>, vector<1x3xf32>
    %cst_40 = arith.constant dense<0.000000e+00> : vector<16x3xf32>
    %48 = tpu.matmul %45, %46, %cst_40 {dimension_numbers = #tpu.dot_dimension_numbers<[1], [0], [0], [1], [0, 0, 1, 1], [], []>} : vector<16x4xbf16>, vector<4x3xbf16>, vector<16x3xf32> -> vector<16x3xf32>
    %49 = vector.broadcast %47 : vector<1x3xf32> to vector<16x3xf32>
    %50 = arith.addf %48, %49 : vector<16x3xf32>
    %c0_41 = arith.constant 0 : index
    %c124 = arith.constant 124 : index
    %51 = vector.load %arg14[%c0_41, %c124] : memref<16x128xf32, #tpu.memory_space<vmem>>, vector<16x3xf32>
    tpu.vector_store %arg14[%c0_41, %c124], %50 {strides = array<i32>} : memref<16x128xf32, #tpu.memory_space<vmem>>, vector<16x3xf32>,
    %cst_42 = arith.constant 0.000000e+00 : f32
    %52 = vector.broadcast %cst_42 : f32 to vector<16x1xf32>
    %c0_43 = arith.constant 0 : index
    %c127 = arith.constant 127 : index
    %53 = vector.load %arg14[%c0_43, %c127] : memref<16x128xf32, #tpu.memory_space<vmem>>, vector<16x1xf32>
    tpu.vector_store %arg14[%c0_43, %c127], %52 {strides = array<i32>} : memref<16x128xf32, #tpu.memory_space<vmem>>, vector<16x1xf32>,
    return
  }
  func.func @transform_0(%arg0: i32) -> (i32, i32) {
    %c0_i32 = arith.constant 0 : i32
    %c0_i32_0 = arith.constant 0 : i32
    return %arg0, %c0_i32 : i32, i32
  }
  func.func @transform_1(%arg0: i32) -> (i32, i32) {
    %c0_i32 = arith.constant 0 : i32
    %c0_i32_0 = arith.constant 0 : i32
    %c0_i32_1 = arith.constant 0 : i32
    return %c0_i32, %c0_i32_0 : i32, i32
  }
  func.func @transform_2(%arg0: i32) -> (i32, i32) {
    %c0_i32 = arith.constant 0 : i32
    %c0_i32_0 = arith.constant 0 : i32
    %c0_i32_1 = arith.constant 0 : i32
    return %c0_i32, %c0_i32_0 : i32, i32
  }
  func.func @transform_3(%arg0: i32) -> (i32, i32) {
    %c0_i32 = arith.constant 0 : i32
    %c0_i32_0 = arith.constant 0 : i32
    %c0_i32_1 = arith.constant 0 : i32
    return %c0_i32, %c0_i32_0 : i32, i32
  }
  func.func @transform_4(%arg0: i32) -> (i32, i32) {
    %c0_i32 = arith.constant 0 : i32
    %c0_i32_0 = arith.constant 0 : i32
    %c0_i32_1 = arith.constant 0 : i32
    return %c0_i32, %c0_i32_0 : i32, i32
  }
  func.func @transform_5(%arg0: i32) -> (i32, i32) {
    %c0_i32 = arith.constant 0 : i32
    %c0_i32_0 = arith.constant 0 : i32
    %c0_i32_1 = arith.constant 0 : i32
    return %c0_i32, %c0_i32_0 : i32, i32
  }
  func.func @transform_6(%arg0: i32) -> (i32, i32) {
    %c0_i32 = arith.constant 0 : i32
    %c0_i32_0 = arith.constant 0 : i32
    %c0_i32_1 = arith.constant 0 : i32
    return %c0_i32, %c0_i32_0 : i32, i32
  }
  func.func @transform_7(%arg0: i32) -> (i32, i32) {
    %c0_i32 = arith.constant 0 : i32
    %c0_i32_0 = arith.constant 0 : i32
    %c0_i32_1 = arith.constant 0 : i32
    return %c0_i32, %c0_i32_0 : i32, i32
  }
  func.func @transform_8(%arg0: i32) -> (i32, i32) {
    %c0_i32 = arith.constant 0 : i32
    %c0_i32_0 = arith.constant 0 : i32
    %c0_i32_1 = arith.constant 0 : i32
    return %c0_i32, %c0_i32_0 : i32, i32
  }
  func.func @transform_9(%arg0: i32) -> (i32, i32) {
    %c0_i32 = arith.constant 0 : i32
    %c0_i32_0 = arith.constant 0 : i32
    %c0_i32_1 = arith.constant 0 : i32
    return %c0_i32, %c0_i32_0 : i32, i32
  }
  func.func @transform_10(%arg0: i32) -> (i32, i32) {
    %c0_i32 = arith.constant 0 : i32
    %c0_i32_0 = arith.constant 0 : i32
    %c0_i32_1 = arith.constant 0 : i32
    return %c0_i32, %c0_i32_0 : i32, i32
  }
  func.func @transform_11(%arg0: i32) -> (i32, i32) {
    %c0_i32 = arith.constant 0 : i32
    %c0_i32_0 = arith.constant 0 : i32
    %c0_i32_1 = arith.constant 0 : i32
    return %c0_i32, %c0_i32_0 : i32, i32
  }
  func.func @transform_12(%arg0: i32) -> (i32, i32) {
    %c0_i32 = arith.constant 0 : i32
    %c0_i32_0 = arith.constant 0 : i32
    %c0_i32_1 = arith.constant 0 : i32
    return %c0_i32, %c0_i32_0 : i32, i32
  }
  func.func @transform_13(%arg0: i32) -> (i32, i32) {
    %c0_i32 = arith.constant 0 : i32
    %c0_i32_0 = arith.constant 0 : i32
    return %arg0, %c0_i32 : i32, i32
  }
}

</mosaic_0001>

<bundles_post_ra>
// kernel: tpu_custom_call.1
= control target key start
LH: loop header
LB: loop body
LE: loop exit
PB: predicated region body
PF: predicated region fallthrough
CT: control target
= control target key end

     0   :  { %s685_s0 = inlined_call_operand.vmem [shape: bf16[16,128], index: 0, kind: input, shape index: {}]   ;;  %s686_s1 = inlined_call_operand.vmem [shape: bf16[128,64], index: 1, kind: input, shape index: {}]   ;;  %s687_s2 = inlined_call_operand.vmem [shape: f32[1,64], index: 2, kind: input, shape index: {}]   ;;  %s688_s3 = inlined_call_operand.vmem [shape: bf16[64,32], index: 3, kind: input, shape index: {}]   ;;  %s689_s4 = inlined_call_operand.vmem [shape: f32[1,32], index: 4, kind: input, shape index: {}]   ;;  %s690_s5 = inlined_call_operand.vmem [shape: bf16[32,16], index: 5, kind: input, shape index: {}]   ;;  %s691_s6 = inlined_call_operand.vmem [shape: f32[1,16], index: 6, kind: input, shape index: {}]   ;;  %s692_s7 = inlined_call_operand.vmem [shape: bf16[16,8], index: 7, kind: input, shape index: {}]   ;;  %s693_s8 = inlined_call_operand.vmem [shape: f32[1,8], index: 8, kind: input, shape index: {}]   ;;  %s694_s9 = inlined_call_operand.vmem [shape: bf16[8,4], index: 9, kind: input, shape index: {}]   ;;  %s695_s10 = inlined_call_operand.vmem [shape: f32[1,4], index: 10, kind: input, shape index: {}]   ;;  %s696_s11 = inlined_call_operand.vmem [shape: bf16[4,3], index: 11, kind: input, shape index: {}]   ;;  %s697_s12 = inlined_call_operand.vmem [shape: f32[1,3], index: 12, kind: input, shape index: {}]   ;;  %s698_s13 = inlined_call_operand.hbm [shape: f32[16,128], index: 13, kind: output, shape index: {}]  }
   0x1   :  { %v482_v0 = vld [vmem:[%s686_s1 + $0x38] sm:$0xff]  ;;  %v481_v1 = vld [vmem:[%s686_s1 + $0x30] sm:$0xff] }
   0x2   :  { %122 = vmatpush.bf16.msra.mxu0 %v482_v0 }
   0x3   :  { %18 = vsyncpa [#allocation3], 0  ;;  %v480_v2 = vld [vmem:[%s686_s1 + $0x28] sm:$0xff]  ;;  %v479_v3 = vld [vmem:[%s686_s1 + $0x20] sm:$0xff]  ;;  %vm138_vm0 = vcmask 523264   ;;  %s531_s21 = smov 64  }
   0x4   :  { %v478_v4 = vld [vmem:[%s686_s1 + $0x18] sm:$0xff]  ;;  %v477_v5 = vld [vmem:[%s686_s1 + $0x10] sm:$0xff]  ;;  %v476_v6 = vld [vmem:[%s686_s1 + $0x8] sm:$0xff]  ;;  %vm229_vm1 = vcmask 261120   ;;  %vm205_vm2 = vcmask 785920   ;;  %s532_s24 = smov 96  }
   0x5   :  { %v475_v7 = vld [vmem:[%s686_s1] sm:$0xff]  ;;  %v486_v9 = vld [vmem:[%s688_s3 + $0x18] sm:$0xff]  ;;  %v485_v10 = vld [vmem:[%s688_s3 + $0x10] sm:$0xff]  ;;  %vm273_vm3 = vcmask 130048   ;;  %vm314_vm4 = vcmask 1043456   ;;  %vm257_vm5 = vcmask 917248  }
   0x6   :  { %123 = vmatpush.bf16.msra.mxu0 %v481_v1  ;;  %v474_v8 = vld [vmem:[%s685_s0] sm:$0xff]  ;;  %185 = vmatpush.bf16.msra.mxu1 %v486_v9  ;;  %v484_v11 = vld [vmem:[%s688_s3 + $0x8] sm:$0xff]  ;;  %s533_s27 = smov 112   ;;  %vm310_vm6 = vcmask 64512   ;;  %vm355_vm7 = vcmask 1041408   ;;  %vm301_vm8 = vcmask 982912  }
   0x7   :  { %v483_v12 = vld [vmem:[%s688_s3] sm:$0xff]  ;;  %v488_v21 = vld [vmem:[%s690_s5 + $0x8] sm:$0xff]  ;;  %s534_s30 = smov 120   ;;  %vm351_vm9 = vcmask 31744   ;;  %vm342_vm10 = vcmask 1015744   ;;  %vm381_vm11 = vcmask 1040352  }
   0x8   :  { %v499_v13 = vld [vmem:[%s687_s2] ss:$0 sm:$0xff]  ;;  %239 = vmatpush.bf16.msra.mxu2 %v488_v21  ;;  %vm384_vm12 = vcmask 1048568   ;;  %s537_s1 = smov [#allocation2]   ;;  %s393_s17 = sshll.u32 %s698_s13, 4  ;;  %s394_s17 = int_to_ptr.hbm [resolvable:$true] %s393_s17 }
   0x9   :  { %v487_v22 = vld [vmem:[%s690_s5] sm:$0xff]  ;;  %s391_s15 = sshll.u32 %s537_s1, 4  ;;  %s539_s18 = smov 8   ;;  %s392_s15 = int_to_ptr.vmem [resolvable:$true] %s391_s15 }
   0xa   :  { %124 = vmatpush.bf16.msra.mxu0 %v480_v2  ;;  %186 = vmatpush.bf16.msra.mxu1 %v485_v10  ;;  %v500_v23 = vld [vmem:[%s689_s4] ss:$0 sm:$0xff]  ;;  %v536_v10 = vmov 0.0  }
   0xb   :  { %v489_v32 = vld [vmem:[%s692_s7] sm:$0xff] }
   0xc   :  { %240 = vmatpush.bf16.msra.mxu2 %v487_v22  ;;  %284 = vmatpush.bf16.msra.mxu3 %v489_v32  ;;  %v501_v34 = vld [vmem:[%s691_s6] ss:$0 sm:$0xff] }
   0xd   :  { %v305_v42 = vld [vmem:[%s694_s9] sm:$0xf] }
   0xe   :  { %125 = vmatpush.bf16.msra.mxu0 %v479_v3  ;;  %187 = vmatpush.bf16.msra.mxu1 %v484_v11  ;;  %v316_v43 = vsel %vm314_vm4, %v305_v42, 0  ;;  %v502_v46 = vld [vmem:[%s693_s8] ss:$0 sm:$0xff] }
   0xf   :  { %v346_v54 = vld [vmem:[%s696_s11] sm:$0x3] }
  0x10   :  { %325 = vmatpush.bf16.msrb.mxu3 %v316_v43  ;;  %v357_v55 = vsel %vm355_vm7, %v346_v54, 0  ;;  %v503_v58 = vld [vmem:[%s695_s10] ss:$0 sm:$0xff]  ;;  %s535_s10 = smov 124  }
  0x11   :  { %366 = vmatpush.bf16.msrb.mxu2 %v357_v55 }
  0x12   :  { %126 = vmatpush.bf16.msra.mxu0 %v478_v4  ;;  %188 = vmatpush.bf16.msra.mxu1 %v483_v12  ;;  %v504_v4 = vld [vmem:[%s697_s12] ss:$0 sm:$0xff]  ;;  %s538_s12 = smov 128  }
  0x16   :  { %127 = vmatpush.bf16.msra.mxu0 %v477_v5 }
  0x1a   :  { %128 = vmatpush.bf16.msra.mxu0 %v476_v6 }
  0x1e   :  { %129 = vmatpush.bf16.msra.mxu0 %v475_v7 }
  0x21   :  { %130 = vmatmul.bf16.vlgmr.msra.gmra.mxu0 %v474_v8 }
  0x9e   :  { %v131_v14 = vpop.f32.mrf.mxu0 }
  0x9f   :  { %v132_v15 = vadd.f32 %v499_v13, %v131_v14 }
  0xa1   :  { %v136_v16 = vmax.f32 %v132_v15, 0.0 }
  0xa3   :  { %139 = vst.msk [vmem:[#allocation2] sm:$0xff] %vm138_vm0, %v136_v16 }
  0xa6   :  { %v133_v17 = vpop.f32.mrf.mxu0 }
  0xa7   :  { %v134_v18 = vadd.f32 %v499_v13, %v133_v17 }
  0xa9   :  { %v137_v19 = vmax.f32 %v134_v18, 0.0 }
  0xab   :  { %v141_v20 = vpack.c.bf16 %v137_v19, %v136_v16  ;;  %140 = vst.msk [vmem:[#allocation2 + $0x8] sm:$0xff] %vm138_vm0, %v137_v19 }
  0xad   :  { %457 = vmatmul.msk.bf16.vlgmr.msra.gmra.mxu1 %vm138_vm0, %v141_v20 }
 0x12a   :  { %v190_v24 = vpop.f32.mrf.mxu1 }
 0x12b   :  { %v191_v25 = vadd.f32 %v500_v23, %v190_v24 }
 0x12d   :  { %v195_v26 = vmax.f32 %v191_v25, 0.0 }
 0x12f   :  { %199 = vrot.lane.b32.xlu0 %v195_v26, %s531_s21 }
 0x132   :  { %v192_v27 = vpop.f32.mrf.mxu1 }
 0x133   :  { %v193_v28 = vadd.f32 %v500_v23, %v192_v27 }
 0x135   :  { %v196_v29 = vmax.f32 %v193_v28, 0.0 }
 0x137   :  { %v208_v30 = vpack.c.bf16 %v196_v29, %v195_v26  ;;  %201 = vrot.lane.b32.xlu0 %v196_v29, %s531_s21 }
 0x139   :  { %466 = vmatmul.msk.bf16.vlgmr.msra.gmra.mxu2 %vm229_vm1, %v208_v30 }
 0x1a1   :  { %v200_v31 = vpop.permute.xlu0 %199 }
 0x1a2   :  { %206 = vst.msk [vmem:[#allocation2] sm:$0xff] %vm205_vm2, %v200_v31 }
 0x1a9   :  { %v202_v33 = vpop.permute.xlu0 %201 }
 0x1aa   :  { %207 = vst.msk [vmem:[#allocation2 + $0x8] sm:$0xff] %vm205_vm2, %v202_v33 }
 0x1bc   :  { %v242_v35 = vpop.f32.mrf.mxu2 }
 0x1bd   :  { %v243_v36 = vadd.f32 %v501_v34, %v242_v35 }
 0x1bf   :  { %v247_v37 = vmax.f32 %v243_v36, 0.0 }
 0x1c1   :  { %251 = vrot.lane.b32.xlu1 %v247_v37, %s532_s24 }
 0x1c4   :  { %v244_v38 = vpop.f32.mrf.mxu2 }
 0x1c5   :  { %v245_v39 = vadd.f32 %v501_v34, %v244_v38 }
 0x1c7   :  { %v248_v40 = vmax.f32 %v245_v39, 0.0 }
 0x1c9   :  { %v260_v41 = vpack.c.bf16 %v248_v40, %v247_v37  ;;  %253 = vrot.lane.b32.xlu1 %v248_v40, %s532_s24 }
 0x1cb   :  { %471 = vmatmul.msk.bf16.vlgmr.msra.gmra.mxu3 %vm273_vm3, %v260_v41 }
 0x233   :  { %v252_v44 = vpop.permute.xlu1 %251 }
 0x234   :  { %258 = vst.msk [vmem:[#allocation2] sm:$0xff] %vm257_vm5, %v252_v44 }
 0x23b   :  { %v254_v45 = vpop.permute.xlu1 %253 }
 0x23c   :  { %259 = vst.msk [vmem:[#allocation2 + $0x8] sm:$0xff] %vm257_vm5, %v254_v45 }
 0x24e   :  { %v286_v47 = vpop.f32.mrf.mxu3 }
 0x24f   :  { %v287_v48 = vadd.f32 %v502_v46, %v286_v47 }
 0x251   :  { %v291_v49 = vmax.f32 %v287_v48, 0.0 }
 0x253   :  { %295 = vrot.lane.b32.xlu2 %v291_v49, %s533_s27 }
 0x256   :  { %v288_v50 = vpop.f32.mrf.mxu3 }
 0x257   :  { %v289_v51 = vadd.f32 %v502_v46, %v288_v50 }
 0x259   :  { %v292_v52 = vmax.f32 %v289_v51, 0.0 }
 0x25b   :  { %v304_v53 = vpack.c.bf16 %v292_v52, %v291_v49  ;;  %297 = vrot.lane.b32.xlu2 %v292_v52, %s533_s27 }
 0x25d   :  { %472 = vmatmul.msk.bf16.vlgmr.msrb.gmra.mxu3 %vm310_vm6, %v304_v53 }
 0x2ad   :  { %v296_v56 = vpop.permute.xlu2 %295 }
 0x2ae   :  { %302 = vst.msk [vmem:[#allocation2] sm:$0xff] %vm301_vm8, %v296_v56 }
 0x2b5   :  { %v298_v57 = vpop.permute.xlu2 %297 }
 0x2b6   :  { %303 = vst.msk [vmem:[#allocation2 + $0x8] sm:$0xff] %vm301_vm8, %v298_v57 }
 0x2e0   :  { %v327_v59 = vpop.f32.mrf.mxu3 }
 0x2e1   :  { %v328_v60 = vadd.f32 %v503_v58, %v327_v59 }
 0x2e3   :  { %v332_v61 = vmax.f32 %v328_v60, 0.0 }
 0x2e5   :  { %336 = vrot.lane.b32.xlu0 %v332_v61, %s534_s30 }
 0x2e8   :  { %v329_v62 = vpop.f32.mrf.mxu3 }
 0x2e9   :  { %v330_v63 = vadd.f32 %v503_v58, %v329_v62 }
 0x2eb   :  { %v333_v0 = vmax.f32 %v330_v63, 0.0 }
 0x2ed   :  { %v345_v1 = vpack.c.bf16 %v333_v0, %v332_v61  ;;  %338 = vrot.lane.b32.xlu1 %v333_v0, %s534_s30 }
 0x2ef   :  { %473 = vmatmul.msk.bf16.vlgmr.msrb.gmra.mxu2 %vm351_vm9, %v345_v1 }
 0x357   :  { %v337_v2 = vpop.permute.xlu0 %336 }
 0x358   :  { %343 = vst.msk [vmem:[#allocation2] sm:$0xff] %vm342_vm10, %v337_v2 }
 0x35f   :  { %v339_v3 = vpop.permute.xlu1 %338 }
 0x360   :  { %344 = vst.msk [vmem:[#allocation2 + $0x8] sm:$0xff] %vm342_vm10, %v339_v3 }
 0x372   :  { %v368_v5 = vpop.f32.mrf.mxu2 }
 0x373   :  { %v369_v6 = vadd.f32 %v504_v4, %v368_v5 }
 0x375   :  { %375 = vrot.lane.b32.xlu2 %v369_v6, %s535_s10 }
 0x37a   :  { %v370_v7 = vpop.f32.mrf.mxu2 }
 0x37b   :  { %v371_v8 = vadd.f32 %v504_v4, %v370_v7 }
 0x37d   :  { %377 = vrot.lane.b32.xlu0 %v371_v8, %s535_s10 }
 0x3cf   :  { %v376_v9 = vpop.permute.xlu2 %375 }
 0x3d0   :  { %382 = vst.msk [vmem:[#allocation2] sm:$0xff] %vm381_vm11, %v376_v9 }
 0x3d1   :  { %385 = vst.msk [vmem:[#allocation2] sm:$0xff] %vm384_vm12, %v536_v10 }
 0x3ef   :  { %v378_v11 = vpop.permute.xlu0 %377 }
 0x3f0   :  { %383 = vst.msk [vmem:[#allocation2 + $0x8] sm:$0xff] %vm381_vm11, %v378_v11 }
 0x3f1   :  { %386 = vst.msk [vmem:[#allocation2 + $0x8] sm:$0xff] %vm384_vm12, %v536_v10 }
 0x3f2   :  { %399 = dma.vmem_to_hbm [thread:$0]  %s392_s15, 256, %s394_s17, [#allocation3], %s538_s12, %s538_s12, %s539_s18  }
 0x3f3   :  { %529 = dma.done.wait [#allocation3], 256  }
 0x3f4   :  { %530 = vsyncadd [#allocation3], 4294967040 }
 0x3f5   :  { %404 = vsyncpa [#allocation3], 1 }

</bundles_post_ra>
